<compile_context>
chip_gen: v7x
topology: tpu7x:2x2x1
jax: 0.10.0
libtpu: 0.0.40
codegen_flags: <defaults>
</compile_context>

<pallas_src>
import jax
import jax.numpy as jnp
from jax.experimental import pallas as pl
from jax.experimental.pallas import tpu as pltpu


def _se_kernel(x_ref, w1t_ref, b1_ref, w2t_ref, b2_ref, o_ref):
    # x_ref block: (TB, HW, C), channels on the lane axis.
    x = x_ref[...]                                           # (TB, HW, C)

    # ---- squeeze: global sum pool over spatial axis (1/HW folded into w1t) --
    pooled = jnp.sum(x.astype(jnp.float32), axis=1)          # (TB, C)

    # ---- excitation: batched 1x1 convs == batched matmuls -------------------
    w1t = w1t_ref[...]                                       # (C, Cr) f32, pre-scaled by 1/HW
    b1 = b1_ref[...]                                         # (1, Cr) f32
    w2t = w2t_ref[...]                                       # (Cr, C) f32
    b2 = b2_ref[...]                                         # (1, C)  f32

    h = jnp.dot(pooled, w1t, preferred_element_type=jnp.float32) + b1   # (TB, Cr)
    h = jnp.maximum(h, 0.0)                                              # ReLU
    g = jnp.dot(h, w2t, preferred_element_type=jnp.float32) + b2         # (TB, C)
    gate = jax.nn.sigmoid(g).astype(x.dtype)                              # (TB, C)

    # ---- scale: stride-0 sublane broadcast of the gate over HW --------------
    o_ref[...] = x * gate[:, None, :]


def _pick_tb(n, hw, c, itemsize):
    """Largest divisor of N that keeps the x block within budget and >=2 grid steps."""
    block_budget_bytes = 4 * 1024 * 1024          # per x block; ~4x with in+out double buffering
    max_tb = max(1, block_budget_bytes // max(1, hw * c * itemsize))
    if n >= 2:
        max_tb = min(max_tb, n // 2)              # keep >= 2 grid steps (v7x has 2 TCs)
    tb = 1
    for d in range(1, n + 1):
        if n % d == 0 and d <= max_tb:
            tb = d
    return tb


def se_block(x, w1, b1, w2, b2):
    """x: (N, C, H, W). w1: (Cr, C), b1: (Cr,), w2: (C, Cr), b2: (C,)."""
    N, C, H, W = x.shape
    Cr = w1.shape[0]
    HW = H * W
    itemsize = jnp.dtype(x.dtype).itemsize

    # Channels-last layout for the kernel (lane-dense stores on C).
    x_nhwc = jnp.transpose(x.reshape(N, C, HW), (0, 2, 1))   # (N, HW, C)

    # Fold the 1/HW average-pool scale into w1; biases lane-major.
    w1t = (w1.astype(jnp.float32).T) * (1.0 / HW)            # (C, Cr)
    b1_row = b1.astype(jnp.float32).reshape(1, Cr)           # (1, Cr)
    w2t = w2.astype(jnp.float32).T                           # (Cr, C)
    b2_row = b2.astype(jnp.float32).reshape(1, C)            # (1, C)

    tb = _pick_tb(N, HW, C, itemsize)
    grid = (N // tb,)

    weight_bytes = (w1t.size + b1_row.size + w2t.size + b2_row.size) * 4
    cost = pl.CostEstimate(
        flops=int(2 * N * C * Cr * 2 + 2 * N * C * HW),
        transcendentals=int(N * C),
        bytes_accessed=int(2 * N * C * HW * itemsize + weight_bytes),
    )

    out_nhwc = pl.pallas_call(
        _se_kernel,
        out_shape=jax.ShapeDtypeStruct((N, HW, C), x.dtype),
        grid_spec=pltpu.PrefetchScalarGridSpec(
            num_scalar_prefetch=0,
            grid=grid,
            in_specs=[
                pl.BlockSpec((tb, HW, C), lambda n: (n, 0, 0)),   # x (channels-last)
                pl.BlockSpec((C, Cr), lambda n: (0, 0)),          # w1.T / HW
                pl.BlockSpec((1, Cr), lambda n: (0, 0)),          # b1 (lane-major)
                pl.BlockSpec((Cr, C), lambda n: (0, 0)),          # w2.T
                pl.BlockSpec((1, C), lambda n: (0, 0)),           # b2 (lane-major)
            ],
            out_specs=pl.BlockSpec((tb, HW, C), lambda n: (n, 0, 0)),
        ),
        compiler_params=pltpu.CompilerParams(
            dimension_semantics=("parallel",),
            vmem_limit_bytes=48 * 1024 * 1024,
        ),
        cost_estimate=cost,
    )(x_nhwc, w1t, b1_row, w2t, b2_row)

    return jnp.transpose(out_nhwc, (0, 2, 1)).reshape(N, C, H, W)


def se_block_ref(x, w1, b1, w2, b2):
    """Pure-JAX reference matching the PyTorch forward."""
    pooled = jnp.mean(x, axis=(2, 3))                       # (N, C)
    h = jnp.maximum(pooled @ w1.T + b1, 0.0)                # (N, Cr)
    gate = jax.nn.sigmoid(h @ w2.T + b2)                    # (N, C)
    return x * gate[:, :, None, None]


if __name__ == "__main__":
    # Small shapes consistent with the module: in_channels=32, reduction_ratio=4.
    N, C, H, W = 2, 32, 8, 8
    reduction_ratio = 4
    Cr = C // reduction_ratio

    key = jax.random.PRNGKey(0)
    kx, kw1, kb1, kw2, kb2 = jax.random.split(key, 5)

    x = jax.random.normal(kx, (N, C, H, W), dtype=jnp.float32)
    # Deterministic synthetic parameters (Conv2d 1x1 weights, squeezed to 2D).
    w1 = jax.random.normal(kw1, (Cr, C), dtype=jnp.float32) * 0.1
    b1 = jax.random.normal(kb1, (Cr,), dtype=jnp.float32) * 0.1
    w2 = jax.random.normal(kw2, (C, Cr), dtype=jnp.float32) * 0.1
    b2 = jax.random.normal(kb2, (C,), dtype=jnp.float32) * 0.1

    out = se_block(x, w1, b1, w2, b2)
    out = jax.block_until_ready(out)

    ref = se_block_ref(x, w1, b1, w2, b2)
    assert out.shape == (N, C, H, W)
    assert jnp.allclose(out, ref, atol=1e-5, rtol=1e-5), "mismatch vs reference"

    print("KERNEL_OK")
</pallas_src>

<mosaic_0001>
module attributes {stable_mosaic.version = 11 : i64} {
  func.func @_se_kernel(%arg0: i32, %arg1: memref<1x64x32xf32, #tpu.memory_space<vmem>>, %arg2: memref<32x8xf32, #tpu.memory_space<vmem>>, %arg3: memref<1x8xf32, #tpu.memory_space<vmem>>, %arg4: memref<8x32xf32, #tpu.memory_space<vmem>>, %arg5: memref<1x32xf32, #tpu.memory_space<vmem>>, %arg6: memref<1x64x32xf32, #tpu.memory_space<vmem>>) attributes {dimension_semantics = [#tpu.dimension_semantics<parallel>], iteration_bounds = array<i64: 2>, scalar_prefetch = 0 : i64, scratch_operands = 0 : i64, tpu.core_type = #tpu.core_type<tc>, window_params = [{transform_indices = @transform_0, window_bounds = array<i64: 1, 64, 32>}, {pipeline_mode = #tpu.pipeline_mode<synchronous>, transform_indices = @transform_1, window_bounds = array<i64: 32, 8>}, {pipeline_mode = #tpu.pipeline_mode<synchronous>, transform_indices = @transform_2, window_bounds = array<i64: 1, 8>}, {pipeline_mode = #tpu.pipeline_mode<synchronous>, transform_indices = @transform_3, window_bounds = array<i64: 8, 32>}, {pipeline_mode = #tpu.pipeline_mode<synchronous>, transform_indices = @transform_4, window_bounds = array<i64: 1, 32>}, {transform_indices = @transform_5, window_bounds = array<i64: 1, 64, 32>}]} {
    %c0 = arith.constant 0 : index
    %c0_0 = arith.constant 0 : index
    %c0_1 = arith.constant 0 : index
    %0 = vector.load %arg1[%c0, %c0_0, %c0_1] : memref<1x64x32xf32, #tpu.memory_space<vmem>>, vector<1x64x32xf32>
    %cst = arith.constant dense<0.000000e+00> : vector<1x32xf32>
    %1 = vector.multi_reduction <add>, %0, %cst [1] : vector<1x64x32xf32> to vector<1x32xf32>
    %c0_2 = arith.constant 0 : index
    %c0_3 = arith.constant 0 : index
    %2 = vector.load %arg2[%c0_2, %c0_3] : memref<32x8xf32, #tpu.memory_space<vmem>>, vector<32x8xf32>
    %c0_4 = arith.constant 0 : index
    %c0_5 = arith.constant 0 : index
    %3 = vector.load %arg3[%c0_4, %c0_5] : memref<1x8xf32, #tpu.memory_space<vmem>>, vector<1x8xf32>
    %c0_6 = arith.constant 0 : index
    %c0_7 = arith.constant 0 : index
    %4 = vector.load %arg4[%c0_6, %c0_7] : memref<8x32xf32, #tpu.memory_space<vmem>>, vector<8x32xf32>
    %c0_8 = arith.constant 0 : index
    %c0_9 = arith.constant 0 : index
    %5 = vector.load %arg5[%c0_8, %c0_9] : memref<1x32xf32, #tpu.memory_space<vmem>>, vector<1x32xf32>
    %cst_10 = arith.constant dense<0.000000e+00> : vector<1x8xf32>
    %6 = tpu.matmul %1, %2, %cst_10 {dimension_numbers = #tpu.dot_dimension_numbers<[1], [0], [0], [1], [0, 0, 1, 1], [], []>} : vector<1x32xf32>, vector<32x8xf32>, vector<1x8xf32> -> vector<1x8xf32>
    %7 = arith.addf %6, %3 : vector<1x8xf32>
    %cst_11 = arith.constant 0.000000e+00 : f32
    %8 = vector.broadcast %cst_11 : f32 to vector<1x8xf32>
    %9 = arith.maximumf %7, %8 : vector<1x8xf32>
    %cst_12 = arith.constant dense<0.000000e+00> : vector<1x32xf32>
    %10 = tpu.matmul %9, %4, %cst_12 {dimension_numbers = #tpu.dot_dimension_numbers<[1], [0], [0], [1], [0, 0, 1, 1], [], []>} : vector<1x8xf32>, vector<8x32xf32>, vector<1x32xf32> -> vector<1x32xf32>
    %11 = arith.addf %10, %5 : vector<1x32xf32>
    %12 = arith.negf %11 : vector<1x32xf32>
    %13 = math.exp %12 : vector<1x32xf32>
    %cst_13 = arith.constant 1.000000e+00 : f32
    %14 = vector.broadcast %cst_13 : f32 to vector<1x32xf32>
    %15 = arith.addf %14, %13 : vector<1x32xf32>
    %16 = arith.divf %14, %15 : vector<1x32xf32>
    %17 = vector.shape_cast %16 : vector<1x32xf32> to vector<1x1x32xf32>
    %18 = vector.broadcast %17 : vector<1x1x32xf32> to vector<1x64x32xf32>
    %19 = arith.mulf %0, %18 : vector<1x64x32xf32>
    %c0_14 = arith.constant 0 : index
    %c0_15 = arith.constant 0 : index
    %c0_16 = arith.constant 0 : index
    %20 = vector.load %arg6[%c0_14, %c0_15, %c0_16] : memref<1x64x32xf32, #tpu.memory_space<vmem>>, vector<1x64x32xf32>
    tpu.vector_store %arg6[%c0_14, %c0_15, %c0_16], %19 {strides = array<i32>} : memref<1x64x32xf32, #tpu.memory_space<vmem>>, vector<1x64x32xf32>,
    return
  }
  func.func @transform_0(%arg0: i32) -> (i32, i32, i32) {
    %c0_i32 = arith.constant 0 : i32
    %c0_i32_0 = arith.constant 0 : i32
    %c0_i32_1 = arith.constant 0 : i32
    return %arg0, %c0_i32, %c0_i32_0 : i32, i32, i32
  }
  func.func @transform_1(%arg0: i32) -> (i32, i32) {
    %c0_i32 = arith.constant 0 : i32
    %c0_i32_0 = arith.constant 0 : i32
    %c0_i32_1 = arith.constant 0 : i32
    return %c0_i32, %c0_i32_0 : i32, i32
  }
  func.func @transform_2(%arg0: i32) -> (i32, i32) {
    %c0_i32 = arith.constant 0 : i32
    %c0_i32_0 = arith.constant 0 : i32
    %c0_i32_1 = arith.constant 0 : i32
    return %c0_i32, %c0_i32_0 : i32, i32
  }
  func.func @transform_3(%arg0: i32) -> (i32, i32) {
    %c0_i32 = arith.constant 0 : i32
    %c0_i32_0 = arith.constant 0 : i32
    %c0_i32_1 = arith.constant 0 : i32
    return %c0_i32, %c0_i32_0 : i32, i32
  }
  func.func @transform_4(%arg0: i32) -> (i32, i32) {
    %c0_i32 = arith.constant 0 : i32
    %c0_i32_0 = arith.constant 0 : i32
    %c0_i32_1 = arith.constant 0 : i32
    return %c0_i32, %c0_i32_0 : i32, i32
  }
  func.func @transform_5(%arg0: i32) -> (i32, i32, i32) {
    %c0_i32 = arith.constant 0 : i32
    %c0_i32_0 = arith.constant 0 : i32
    %c0_i32_1 = arith.constant 0 : i32
    return %arg0, %c0_i32, %c0_i32_0 : i32, i32, i32
  }
}

</mosaic_0001>

<bundles_post_ra>
// kernel: tpu_custom_call.1
= control target key start
LH: loop header
LB: loop body
LE: loop exit
PB: predicated region body
PF: predicated region fallthrough
CT: control target
= control target key end

     0   :  { %s592_s18 = smov 0   ;;  %s654_s0 = inlined_call_operand.vmem [shape: f32[2,64,32], index: 0, kind: input, shape index: {}]   ;;  %s655_s1 = inlined_call_operand.vmem [shape: f32[32,8], index: 1, kind: input, shape index: {}]   ;;  %s656_s2 = inlined_call_operand.vmem [shape: f32[1,8], index: 2, kind: input, shape index: {}]   ;;  %s657_s3 = inlined_call_operand.vmem [shape: f32[8,32], index: 3, kind: input, shape index: {}]   ;;  %s658_s4 = inlined_call_operand.vmem [shape: f32[1,32], index: 4, kind: input, shape index: {}]   ;;  %s659_s5 = inlined_call_operand.vmem [shape: f32[2,64,32], index: 5, kind: output, shape index: {}]  }
   0x1 LB: > { %s491_s19 = sadd.s32 4294967295, %s557_s18   ;;  %p495_p0 = scmp.ge.s32.totalorder %s557_s18, 1  ;;  %s557_s18 = sphi %s592_s18, %s15_s18  }
   0x2   : > { %p187_p1 = scmp.lt.s32.totalorder %s557_s18, 3 }
   0x4   : > { %p188_p2 = pnand %p495_p0, %p187_p1 }
   0x5   : > { %v255_v0 = vld [vmem:[%s655_s1] sm:$0xff] (!%p188_p2)  ;;  %v256_v1 = vld [vmem:[%s655_s1 + $0x8] sm:$0xff] (!%p188_p2)  ;;  %v257_v2 = vld [vmem:[%s655_s1 + $0x10] sm:$0xff] (!%p188_p2)  ;;  %v559_v3 = vmov (!%p188_p2), 0.0|0.0   ;;  %vm560_vm0 = vmmov (!%p188_p2), 0   ;;  %v561_v6 = vmov (!%p188_p2), 0.0   ;;  %v416_v50 = vlaneseq (!%p188_p2) }
   0x6   : > { %191 = sbr.rel (%p188_p2) target bundleno = 508 (0x1fc), region = 40  ;;  %530 = vmatprep.subr.bf16.mxu0 (!%p188_p2), %v559_v3  ;;  %v531_v4 = vpack.c.bf16 (!%p188_p2), %v256_v1, %v255_v0  ;;  %v258_v5 = vld [vmem:[%s655_s1 + $0x18] sm:$0xff] (!%p188_p2)  ;;  %522 = vmatprep.mubr.msk.f32.mxu0 (!%p188_p2), %vm560_vm0, %v561_v6  ;;  %p215_p3 = scmp.lt.s32.totalorder (!%p188_p2), %s491_s19, 1  ;;  %vm233_vm1 = vcmask (!%p188_p2), 261120   ;;  %v260_v37 = vld [vmem:[%s657_s3] sm:$0xff] (!%p188_p2)  ;;  %vm336_vm2 = vcmask (!%p188_p2), 64512  }
   0x7   : > { %525 = vmatprep.subr.mxu1 (!%p188_p2), %v561_v6  ;;  %527 = vmatprep.mubr.msk.f32.mxu1 (!%p188_p2), %vm560_vm0, %v561_v6  ;;  %v534_v7 = vpack.c.bf16 (!%p188_p2), %v258_v5, %v257_v2  ;;  %v259_v38 = vld [vmem:[%s656_s2] sm:$0x1] (!%p188_p2)  ;;  %v417_v51 = vshrl.u32 (!%p188_p2), %v416_v50, 7 }
   0x8   : > { %532 = vmatpush3.bf16.msra.mxu0 (!%p188_p2), %v531_v4  ;;  %526 = vmatpush3.msra.mxu1 (!%p188_p2), %v260_v37  ;;  %v261_v43 = vld [vmem:[%s658_s4] sm:$0x1] (!%p188_p2) }
   0x9   : > { %533 = vmatprep.subr.bf16.mxu0 (!%p188_p2), %v559_v3  ;;  %v418_v52 = vsub.s32 (!%p188_p2), 0, %v417_v51 }
   0xc   : > { %535 = vmatpush3.bf16.msra.mxu0 (!%p188_p2), %v534_v7 }
   0xd   : > { %s661_s19 = smov (!%p215_p3, %s491_s19), 1 }
   0xe   : > { %s505_s28 = sshll.u32 %s661_s19, 6 }
   0xf   : > { %s219_s6 = scalar_lea.vmem %s654_s0, %s505_s28  ;;  %s224_s15 = scalar_lea.vmem %s659_s5, %s505_s28 }
  0x10   : > { %v225_v8 = vld [vmem:[%s219_s6] sm:$0xff]  ;;  %v226_v9 = vld [vmem:[%s219_s6 + $0x8] sm:$0xff]  ;;  %v227_v10 = vld [vmem:[%s219_s6 + $0x10] sm:$0xff] }
  0x11   : > { %v228_v11 = vld [vmem:[%s219_s6 + $0x18] sm:$0xff]  ;;  %v234_v12 = vsel %vm233_vm1, %v225_v8, 0.0  ;;  %v235_v13 = vsel %vm233_vm1, %v226_v9, 0.0  ;;  %v237_v14 = vsel %vm233_vm1, %v227_v10, 0.0  ;;  %v229_v15 = vld [vmem:[%s219_s6 + $0x20] sm:$0xff]  ;;  %v230_v18 = vld [vmem:[%s219_s6 + $0x28] sm:$0xff] }
  0x12   : > { %v236_v16 = vadd.f32 %v235_v13, %v234_v12  ;;  %v239_v17 = vsel %vm233_vm1, %v228_v11, 0.0  ;;  %v241_v20 = vsel %vm233_vm1, %v229_v15, 0.0  ;;  %v231_v21 = vld [vmem:[%s219_s6 + $0x30] sm:$0xff]  ;;  %v243_v23 = vsel %vm233_vm1, %v230_v18, 0.0  ;;  %v232_v24 = vld [vmem:[%s219_s6 + $0x38] sm:$0xff] }
  0x13   : > { %v245_v26 = vsel %vm233_vm1, %v231_v21, 0.0  ;;  %v247_v28 = vsel %vm233_vm1, %v232_v24, 0.0 }
  0x14   : > { %v238_v19 = vadd.f32 %v237_v14, %v236_v16 }
  0x16   : > { %v240_v22 = vadd.f32 %v239_v17, %v238_v19 }
  0x18   : > { %v242_v25 = vadd.f32 %v241_v20, %v240_v22 }
  0x1a   : > { %v244_v27 = vadd.f32 %v243_v23, %v242_v25 }
  0x1c   : > { %v246_v29 = vadd.f32 %v245_v26, %v244_v27 }
  0x1e   : > { %v248_v30 = vadd.f32 %v247_v28, %v246_v29 }
  0x20   : > { %v249_v31 = vrot.slane %v248_v30, 4 }
  0x22   : > { %v250_v32 = vadd.f32 %v249_v31, %v248_v30 }
  0x24   : > { %v251_v33 = vrot.slane %v250_v32, 2 }
  0x26   : > { %v252_v34 = vadd.f32 %v251_v33, %v250_v32 }
  0x28   : > { %v253_v35 = vrot.slane %v252_v34, 1 }
  0x2a   : > { %v254_v36 = vadd.f32 %v253_v35, %v252_v34 }
  0x2c   : > { %523 = vmatmul.mubr.msk.f32.vlgmr.msra.gmra.mrb[0].mxu0 %vm233_vm1, %v254_v36 }
  0xff   : > { %v331_v39 = vpop.f32.mrb[0].mxu0 }
 0x100   : > { %v332_v40 = vadd.f32 %v331_v39, %v259_v38  ;;  %v524_v41 = vpop.f32.mrb[1].mxu0 }
 0x102   : > { %v335_v42 = vmax.f32 %v332_v40, 0.0 }
 0x104   : > { %528 = vmatmul.mubr.msk.f32.vlgmr.msra.gmra.mrb[0].mxu1 %vm336_vm2, %v335_v42 }
 0x1d7   : > { %v406_v44 = vpop.f32.mrb[0].mxu1 }
 0x1d8   : > { %v407_v45 = vadd.f32 %v406_v44, %v261_v43  ;;  %v529_v46 = vpop.f32.mrb[1].mxu1 }
 0x1da   : > { %v502_v47 = vmul.f32 -1.442695, %v407_v45 }
 0x1dc   : > { %547 = vpow2.f32 %v502_v47 }
 0x1e6   : > { %v548_v48 = vpop.eup %547 }
 0x1e7   : > { %v413_v49 = vadd.f32 1.0, %v548_v48 }
 0x1e9   : > { %549 = vrcp.f32 %v413_v49 }
 0x1f3   : > { %v550_v53 = vpop.eup %549 }
 0x1f4   : > { %v419_v54 = vrot.slane %v550_v53, %v418_v52 }
 0x1f6   : > { %v420_v55 = vmul.f32 %v419_v54, %v225_v8  ;;  %v421_v56 = vmul.f32 %v419_v54, %v226_v9  ;;  %v422_v57 = vmul.f32 %v419_v54, %v227_v10  ;;  %v423_v58 = vmul.f32 %v419_v54, %v228_v11 }
 0x1f7   : > { %v424_v59 = vmul.f32 %v419_v54, %v229_v15  ;;  %v425_v60 = vmul.f32 %v419_v54, %v230_v18  ;;  %v426_v61 = vmul.f32 %v419_v54, %v231_v21  ;;  %v427_v62 = vmul.f32 %v419_v54, %v232_v24 }
 0x1f8   : > { %428 = vst.msk [vmem:[%s224_s15] sm:$0xff] %vm233_vm1, %v420_v55  ;;  %429 = vst.msk [vmem:[%s224_s15 + $0x8] sm:$0xff] %vm233_vm1, %v421_v56 }
 0x1f9   : > { %430 = vst.msk [vmem:[%s224_s15 + $0x10] sm:$0xff] %vm233_vm1, %v422_v57  ;;  %431 = vst.msk [vmem:[%s224_s15 + $0x18] sm:$0xff] %vm233_vm1, %v423_v58 }
 0x1fa   : > { %432 = vst.msk [vmem:[%s224_s15 + $0x20] sm:$0xff] %vm233_vm1, %v424_v59  ;;  %433 = vst.msk [vmem:[%s224_s15 + $0x28] sm:$0xff] %vm233_vm1, %v425_v60 }
 0x1fb   : > { %434 = vst.msk [vmem:[%s224_s15 + $0x30] sm:$0xff] %vm233_vm1, %v426_v61  ;;  %435 = vst.msk [vmem:[%s224_s15 + $0x38] sm:$0xff] %vm233_vm1, %v427_v62 }
 0x1fc PF: > { %s15_s18 = sadd.s32 1, %s557_s18  }
 0x1fd   : > { %p12_p4 = scmp.ge.s32.totalorder %s15_s18, 4  }
 0x1ff   :  { %14 = sbr.rel (!%p12_p4) target bundleno = 1 (0x1), region = 70 }

</bundles_post_ra>
